<compile_context>
chip_gen: v7x
topology: tpu7x:2x2x1
jax: 0.10.0
libtpu: 0.0.40
codegen_flags: <defaults>
</compile_context>

<pallas_src>
import functools

import jax
import jax.numpy as jnp
from jax import lax
from jax.experimental import pallas as pl
from jax.experimental.pallas import tpu as pltpu


def _round_up(x, m):
    return ((x + m - 1) // m) * m


# ---------------------------------------------------------------------------
# Kernel 1: per-edge messages (gather + compose + project + norm) and rel@w_rel
# ---------------------------------------------------------------------------
def edge_msg_kernel(col_ref, typ_ref, norm_ref, x_ref, rel_ref, wpack_ref,
                    msg_ref, relout_ref, *, eh_p, hidden):
    """wpack columns: [0:H]=loop_rel*w_loop, [H:2H]=w_in, [2H:3H]=w_out, [3H:4H]=w_rel.
    Edge rows [0, eh_p) are the 'in' direction, [eh_p, 2*eh_p) the 'out' direction."""
    f32, bf16 = jnp.float32, jnp.bfloat16
    e2p = 2 * eh_p
    n_pad = x_ref.shape[0]
    r_pad = rel_ref.shape[0]
    wp = wpack_ref[...]                                                   # (F, 4H) bf16

    # gather x[src] / rel[type] via one-hot matmuls on the MXU (bool -> bf16 cast)
    gsel = (col_ref[...] ==
            lax.broadcasted_iota(jnp.int32, (e2p, n_pad), 1)).astype(bf16)   # (2E, N)
    xj = jnp.dot(gsel, x_ref[...], preferred_element_type=f32)               # (2E, F)
    rsel = (typ_ref[...] ==
            lax.broadcasted_iota(jnp.int32, (e2p, r_pad), 1)).astype(bf16)   # (2E, R)
    rel_e = jnp.dot(rsel, rel_ref[...], preferred_element_type=f32)          # (2E, F)

    prod = (xj * rel_e).astype(bf16)                 # opn == 'mult'

    # one 128-lane MXU pass over the packed weights
    big = jnp.dot(prod, wp, preferred_element_type=f32)                      # (2E, 4H)
    row_pos = lax.broadcasted_iota(jnp.int32, (e2p, hidden), 0)
    msg = jnp.where(row_pos < eh_p,
                    big[:, hidden:2 * hidden],        # w_in  for 'in' edge rows
                    big[:, 2 * hidden:3 * hidden])    # w_out for 'out' edge rows

    # fold the edge norm into the message once (padded edges have norm == 0)
    msg_ref[...] = (norm_ref[...] * msg).astype(bf16)

    # rel_embed @ w_rel (fused second output)
    relout_ref[...] = jnp.dot(rel_ref[...], wp[:, 3 * hidden:],
                              preferred_element_type=f32)


# ---------------------------------------------------------------------------
# Kernel 2: per-node-tile aggregation + loop message + BN + tanh
# ---------------------------------------------------------------------------
def node_agg_kernel(row_ref, x_ref, msg_ref, wloop_ref, bnsc_ref, bnsh_ref,
                    out_ref, *, tile_n, hidden, dense_out):
    f32, bf16 = jnp.float32, jnp.bfloat16
    e2p = msg_ref.shape[0]
    base = pl.multiple_of(pl.program_id(0) * tile_n, tile_n)

    # loop messages: x @ (diag(loop_rel) @ w_loop)  (loop_rel folded in wrapper)
    loop_msg = jnp.dot(x_ref[...], wloop_ref[...], preferred_element_type=f32)  # (T, H)

    # boolean adjacency; norm already folded into msg -> pure compare + cast
    adj = ((row_ref[...] - base) ==
           lax.broadcasted_iota(jnp.int32, (tile_n, e2p), 0)).astype(bf16)      # (T, 2E)
    agg = jnp.dot(adj, msg_ref[...], preferred_element_type=f32)                # (T, H)

    # bn_scale carries the 1/3 averaging; bn_shift carries the conv bias
    out = jnp.tanh((agg + loop_msg) * bnsc_ref[...] + bnsh_ref[...])
    if dense_out:
        out_ref[...] = out.reshape(out_ref.shape)     # lane-dense (T*H/128, 128) store
    else:
        out_ref[...] = out


# ---------------------------------------------------------------------------
# CompGCNConv wrapper
# ---------------------------------------------------------------------------
def compgcn_conv(features, edge_index, edge_type, rel_embed, params):
    """CompGCNConv.forward (features: (N,F), edge_index: (2, 2E), edge_type: (2E,))."""
    n_ent, f_in = features.shape
    hidden = params['w_in'].shape[1]
    n_rel = rel_embed.shape[0]

    rel_cat = jnp.concatenate([rel_embed, params['loop_rel']], axis=0)   # (R+1, F)
    e_half = edge_index.shape[1] // 2
    in_index, out_index = edge_index[:, :e_half], edge_index[:, e_half:]
    in_type, out_type = edge_type[:e_half], edge_type[e_half:]

    def compute_norm(idx):
        row, col = idx[0], idx[1]
        deg = jnp.zeros((n_ent,), jnp.float32).at[row].add(1.0)
        deg_inv = jnp.where(deg > 0, lax.rsqrt(deg), 0.0)
        return deg_inv[row] * deg_inv[col]

    norm_in = compute_norm(in_index)
    norm_out = compute_norm(out_index)

    # ---- padding / tiling: keep lane axes 128-aligned ----
    eh_p = max(_round_up(e_half, 64), 64)            # 2*eh_p is a multiple of 128
    e2p = 2 * eh_p
    n_pad = max(_round_up(n_ent, 128), 128)
    tile_n = min(512, n_pad)                         # bigger tiles amortize grid overhead
    n_pad = _round_up(n_pad, tile_n)
    r_pad = max(_round_up(n_rel + 1, 128), 128)

    def pad1(v, total, fill=0):
        return jnp.pad(v, (0, total - v.shape[0]), constant_values=fill)

    # padded edges: norm = 0 -> zero message; indices point to slot 0
    row = jnp.concatenate([pad1(in_index[0], eh_p), pad1(out_index[0], eh_p)]).astype(jnp.int32)
    col = jnp.concatenate([pad1(in_index[1], eh_p), pad1(out_index[1], eh_p)]).astype(jnp.int32)
    typ = jnp.concatenate([pad1(in_type, eh_p), pad1(out_type, eh_p)]).astype(jnp.int32)
    norm = jnp.concatenate([pad1(norm_in, eh_p, 0.0), pad1(norm_out, eh_p, 0.0)]).astype(jnp.float32)

    row2d = row.reshape(1, e2p)
    col2d = col.reshape(e2p, 1)
    typ2d = typ.reshape(e2p, 1)
    norm2d = norm.reshape(e2p, 1)

    # bf16 HBM residents (halves feature DMA + VMEM footprint); MXU accumulates f32
    x_pad = jnp.pad(features.astype(jnp.float32), ((0, n_pad - n_ent), (0, 0))).astype(jnp.bfloat16)
    rel_pad = jnp.pad(rel_cat.astype(jnp.float32),
                      ((0, r_pad - (n_rel + 1)), (0, 0))).astype(jnp.bfloat16)

    # algebraic folds: loop_rel into w_loop; conv bias and the 1/3 averaging into BN
    w_loop_s = params['loop_rel'].reshape(f_in, 1) * params['w_loop']
    wpack = jnp.concatenate([w_loop_s, params['w_in'], params['w_out'], params['w_rel']],
                            axis=1).astype(jnp.bfloat16)                 # (F, 4H)
    wloop_b = w_loop_s.astype(jnp.bfloat16)

    inv_std = lax.rsqrt(params['bn_var'] + 1e-5)
    bn_scale = (params['bn_gamma'] * inv_std / 3.0).reshape(1, hidden).astype(jnp.float32)
    bn_shift = (params['bn_beta'] +
                (params['bias'] - params['bn_mean']) * params['bn_gamma'] * inv_std
                ).reshape(1, hidden).astype(jnp.float32)

    # ---- call 1: edge messages + rel transform (one shot) ----
    # TODO(synk): chunk the one-hot gather over the node axis for very large graphs
    # (O(E*N) VMEM); fine at these sizes.
    msg, rel_out_pad = pl.pallas_call(
        functools.partial(edge_msg_kernel, eh_p=eh_p, hidden=hidden),
        out_shape=(jax.ShapeDtypeStruct((e2p, hidden), jnp.bfloat16),
                   jax.ShapeDtypeStruct((r_pad, hidden), jnp.float32)),
        grid=(1,),
        in_specs=[
            pl.BlockSpec((e2p, 1), lambda i: (0, 0)),            # col (message source)
            pl.BlockSpec((e2p, 1), lambda i: (0, 0)),            # edge type
            pl.BlockSpec((e2p, 1), lambda i: (0, 0)),            # edge norm
            pl.BlockSpec((n_pad, f_in), lambda i: (0, 0)),       # features (bf16)
            pl.BlockSpec((r_pad, f_in), lambda i: (0, 0)),       # rel_embed (+loop_rel)
            pl.BlockSpec((f_in, 4 * hidden), lambda i: (0, 0)),  # packed weights
        ],
        out_specs=(pl.BlockSpec((e2p, hidden), lambda i: (0, 0)),
                   pl.BlockSpec((r_pad, hidden), lambda i: (0, 0))),
        compiler_params=pltpu.CompilerParams(
            dimension_semantics=("arbitrary",),
            vmem_limit_bytes=32 * 1024 * 1024),
    )(col2d, typ2d, norm2d, x_pad, rel_pad, wpack)

    # ---- call 2: node aggregation, tiled + parallel over node rows ----
    dense_out = (hidden % 128 != 0) and ((tile_n * hidden) % 1024 == 0)

    def run_node_agg(single_buffer):
        def inv_spec(shape):
            idx_map = lambda i, _s=shape: (0,) * len(_s)
            if single_buffer:
                return pl.BlockSpec(shape, idx_map, pipeline_mode=pl.Buffered(1))
            return pl.BlockSpec(shape, idx_map)

        if dense_out:
            out_shape = jax.ShapeDtypeStruct((n_pad * hidden // 128, 128), jnp.float32)
            out_spec = pl.BlockSpec((tile_n * hidden // 128, 128), lambda i: (i, 0))
        else:
            out_shape = jax.ShapeDtypeStruct((n_pad, hidden), jnp.float32)
            out_spec = pl.BlockSpec((tile_n, hidden), lambda i: (i, 0))

        return pl.pallas_call(
            functools.partial(node_agg_kernel, tile_n=tile_n, hidden=hidden,
                              dense_out=dense_out),
            out_shape=out_shape,
            grid=(n_pad // tile_n,),
            in_specs=[
                inv_spec((1, e2p)),                              # row (scatter target)
                pl.BlockSpec((tile_n, f_in), lambda i: (i, 0)),  # node-tile features
                inv_spec((e2p, hidden)),                         # norm-weighted messages
                inv_spec((f_in, hidden)),                        # loop_rel-folded w_loop
                inv_spec((1, hidden)),                           # bn scale (carries 1/3)
                inv_spec((1, hidden)),                           # bn shift (carries bias)
            ],
            out_specs=out_spec,
            compiler_params=pltpu.CompilerParams(
                dimension_semantics=("parallel",),               # megacore-friendly (v7x)
                vmem_limit_bytes=32 * 1024 * 1024),
        )(row2d, x_pad, msg, wloop_b, bn_scale, bn_shift)

    try:
        x_out_pad = run_node_agg(single_buffer=True)
    except Exception:
        # fallback if pipeline_mode=pl.Buffered(1) is not supported by this jax build
        x_out_pad = run_node_agg(single_buffer=False)

    if dense_out:
        x_out_pad = x_out_pad.reshape(n_pad, hidden)
    return x_out_pad[:n_ent], rel_out_pad[:n_rel]


# ---------------------------------------------------------------------------
# GCN.forward
# ---------------------------------------------------------------------------
def gcn_forward(params, index, label, sentence_mask, edges_type, features, edges):
    del sentence_mask                             # unused in the reference forward
    edges = edges.T                               # (2, 2E)
    x, _r = compgcn_conv(features, edges, edges_type, params['init_rel'], params)

    # take_logits + cat(dim=1)  (tiny gathers, left to XLA)
    gathered = [x[idx] for idx in index]
    xcat = jnp.concatenate(gathered, axis=1)      # (B, 2H)

    # fc + CrossEntropyLoss (sub-microsecond matmul: left to XLA, not a pallas_call)
    logits = xcat @ params['fc_w'].T + params['fc_b']
    logp = jax.nn.log_softmax(logits, axis=-1)
    loss = -jnp.mean(jnp.take_along_axis(logp, label[:, None], axis=1))
    return loss, logits


# ---------------------------------------------------------------------------
# Deterministic parameter init (xavier_normal like torch)
# ---------------------------------------------------------------------------
def xavier_normal(key, shape):
    fan_in, fan_out = shape[-2], shape[-1]
    std = (2.0 / (fan_in + fan_out)) ** 0.5
    return std * jax.random.normal(key, shape, jnp.float32)


if __name__ == "__main__":
    key = jax.random.PRNGKey(0)
    N, F, H, C = 64, 32, 32, 4        # num_ent, nfeature, nhidden, nclass
    n_edge_type = 5
    E_half = 40
    B = 8

    keys = jax.random.split(key, 16)
    params = {
        'w_in':     xavier_normal(keys[0], (F, H)),
        'w_out':    xavier_normal(keys[1], (F, H)),
        'w_loop':   xavier_normal(keys[2], (F, H)),
        'w_rel':    xavier_normal(keys[3], (F, H)),
        'loop_rel': xavier_normal(keys[4], (1, F)),
        'init_rel': xavier_normal(keys[5], (n_edge_type, F)),
        'bias':     jnp.zeros((H,), jnp.float32),
        'bn_gamma': jnp.ones((H,), jnp.float32),
        'bn_beta':  jnp.zeros((H,), jnp.float32),
        'bn_mean':  jnp.zeros((H,), jnp.float32),
        'bn_var':   jnp.ones((H,), jnp.float32),
        'fc_w':     xavier_normal(keys[6], (C, 2 * H)),   # torch Linear weight (C, 2H)
        'fc_b':     jnp.zeros((C,), jnp.float32),
    }

    # graph: E_half forward edges + E_half reverse edges (row 0 = target, row 1 = source)
    src = jax.random.randint(keys[7], (E_half,), 0, N)
    dst = jax.random.randint(keys[8], (E_half,), 0, N)
    etype = jax.random.randint(keys[9], (E_half,), 0, n_edge_type)
    edges = jnp.concatenate([jnp.stack([src, dst], axis=1),
                             jnp.stack([dst, src], axis=1)], axis=0)   # (2E, 2)
    edges_type = jnp.concatenate([etype, etype], axis=0)               # (2E,)

    features = jax.random.normal(keys[10], (N, F), jnp.float32)
    index = [jax.random.randint(keys[11], (B,), 0, N),
             jax.random.randint(keys[12], (B,), 0, N)]
    label = jax.random.randint(keys[13], (B,), 0, C)
    sentence_mask = jnp.ones((B,), jnp.float32)                        # unused

    loss, logits = gcn_forward(params, index, label, sentence_mask,
                               edges_type, features, edges)
    jax.block_until_ready((loss, logits))
    assert logits.shape == (B, C)
    print("KERNEL_OK")
</pallas_src>

<mosaic_0001>
module attributes {stable_mosaic.version = 11 : i64} {
  func.func @edge_msg_kernel(%arg0: i32, %arg1: memref<128x1xi32, #tpu.memory_space<vmem>>, %arg2: memref<128x1xi32, #tpu.memory_space<vmem>>, %arg3: memref<128x1xf32, #tpu.memory_space<vmem>>, %arg4: memref<128x32xbf16, #tpu.memory_space<vmem>>, %arg5: memref<128x32xbf16, #tpu.memory_space<vmem>>, %arg6: memref<32x128xbf16, #tpu.memory_space<vmem>>, %arg7: memref<128x32xbf16, #tpu.memory_space<vmem>>, %arg8: memref<128x32xf32, #tpu.memory_space<vmem>>) attributes {dimension_semantics = [#tpu.dimension_semantics<arbitrary>], iteration_bounds = array<i64: 1>, scalar_prefetch = 0 : i64, scratch_operands = 0 : i64, tpu.core_type = #tpu.core_type<tc>, window_params = [{pipeline_mode = #tpu.pipeline_mode<synchronous>, transform_indices = @transform_0, window_bounds = array<i64: 128, 1>}, {pipeline_mode = #tpu.pipeline_mode<synchronous>, transform_indices = @transform_1, window_bounds = array<i64: 128, 1>}, {pipeline_mode = #tpu.pipeline_mode<synchronous>, transform_indices = @transform_2, window_bounds = array<i64: 128, 1>}, {pipeline_mode = #tpu.pipeline_mode<synchronous>, transform_indices = @transform_3, window_bounds = array<i64: 128, 32>}, {pipeline_mode = #tpu.pipeline_mode<synchronous>, transform_indices = @transform_4, window_bounds = array<i64: 128, 32>}, {pipeline_mode = #tpu.pipeline_mode<synchronous>, transform_indices = @transform_5, window_bounds = array<i64: 32, 128>}, {pipeline_mode = #tpu.pipeline_mode<synchronous>, transform_indices = @transform_6, window_bounds = array<i64: 128, 32>}, {pipeline_mode = #tpu.pipeline_mode<synchronous>, transform_indices = @transform_7, window_bounds = array<i64: 128, 32>}]} {
    %c0 = arith.constant 0 : index
    %c0_0 = arith.constant 0 : index
    %0 = vector.load %arg6[%c0, %c0_0] : memref<32x128xbf16, #tpu.memory_space<vmem>>, vector<32x128xbf16>
    %c0_1 = arith.constant 0 : index
    %c0_2 = arith.constant 0 : index
    %1 = vector.load %arg1[%c0_1, %c0_2] : memref<128x1xi32, #tpu.memory_space<vmem>>, vector<128x1xi32>
    %2 = tpu.iota {dimensions = array<i32: 1>} : vector<128x128xi32>
    %3 = vector.broadcast %1 : vector<128x1xi32> to vector<128x128xi32>
    %4 = arith.cmpi eq, %3, %2 : vector<128x128xi32>
    %5 = arith.extui %4 : vector<128x128xi1> to vector<128x128xi32>
    %6 = arith.sitofp %5 : vector<128x128xi32> to vector<128x128xf32>
    %7 = arith.truncf %6 : vector<128x128xf32> to vector<128x128xbf16>
    %c0_3 = arith.constant 0 : index
    %c0_4 = arith.constant 0 : index
    %8 = vector.load %arg4[%c0_3, %c0_4] : memref<128x32xbf16, #tpu.memory_space<vmem>>, vector<128x32xbf16>
    %cst = arith.constant dense<0.000000e+00> : vector<128x32xf32>
    %9 = tpu.matmul %7, %8, %cst {dimension_numbers = #tpu.dot_dimension_numbers<[1], [0], [0], [1], [0, 0, 1, 1], [], []>} : vector<128x128xbf16>, vector<128x32xbf16>, vector<128x32xf32> -> vector<128x32xf32>
    %c0_5 = arith.constant 0 : index
    %c0_6 = arith.constant 0 : index
    %10 = vector.load %arg2[%c0_5, %c0_6] : memref<128x1xi32, #tpu.memory_space<vmem>>, vector<128x1xi32>
    %11 = tpu.iota {dimensions = array<i32: 1>} : vector<128x128xi32>
    %12 = vector.broadcast %10 : vector<128x1xi32> to vector<128x128xi32>
    %13 = arith.cmpi eq, %12, %11 : vector<128x128xi32>
    %14 = arith.extui %13 : vector<128x128xi1> to vector<128x128xi32>
    %15 = arith.sitofp %14 : vector<128x128xi32> to vector<128x128xf32>
    %16 = arith.truncf %15 : vector<128x128xf32> to vector<128x128xbf16>
    %c0_7 = arith.constant 0 : index
    %c0_8 = arith.constant 0 : index
    %17 = vector.load %arg5[%c0_7, %c0_8] : memref<128x32xbf16, #tpu.memory_space<vmem>>, vector<128x32xbf16>
    %cst_9 = arith.constant dense<0.000000e+00> : vector<128x32xf32>
    %18 = tpu.matmul %16, %17, %cst_9 {dimension_numbers = #tpu.dot_dimension_numbers<[1], [0], [0], [1], [0, 0, 1, 1], [], []>} : vector<128x128xbf16>, vector<128x32xbf16>, vector<128x32xf32> -> vector<128x32xf32>
    %19 = arith.mulf %9, %18 : vector<128x32xf32>
    %20 = arith.truncf %19 : vector<128x32xf32> to vector<128x32xbf16>
    %cst_10 = arith.constant dense<0.000000e+00> : vector<128x128xf32>
    %21 = tpu.matmul %20, %0, %cst_10 {dimension_numbers = #tpu.dot_dimension_numbers<[1], [0], [0], [1], [0, 0, 1, 1], [], []>} : vector<128x32xbf16>, vector<32x128xbf16>, vector<128x128xf32> -> vector<128x128xf32>
    %22 = tpu.iota {dimensions = array<i32: 0>} : vector<128x32xi32>
    %c64_i32 = arith.constant 64 : i32
    %23 = vector.broadcast %c64_i32 : i32 to vector<128x32xi32>
    %24 = arith.cmpi slt, %22, %23 : vector<128x32xi32>
    %25 = vector.extract_strided_slice %21 {offsets = [0, 32], sizes = [128, 32], strides = [1, 1]} : vector<128x128xf32> to vector<128x32xf32>
    %26 = vector.extract_strided_slice %21 {offsets = [0, 64], sizes = [128, 32], strides = [1, 1]} : vector<128x128xf32> to vector<128x32xf32>
    %27 = arith.select %24, %25, %26 : vector<128x32xi1>, vector<128x32xf32>
    %c0_11 = arith.constant 0 : index
    %c0_12 = arith.constant 0 : index
    %28 = vector.load %arg3[%c0_11, %c0_12] : memref<128x1xf32, #tpu.memory_space<vmem>>, vector<128x1xf32>
    %29 = vector.broadcast %28 : vector<128x1xf32> to vector<128x32xf32>
    %30 = arith.mulf %29, %27 : vector<128x32xf32>
    %31 = arith.truncf %30 : vector<128x32xf32> to vector<128x32xbf16>
    %c0_13 = arith.constant 0 : index
    %c0_14 = arith.constant 0 : index
    %32 = vector.load %arg7[%c0_13, %c0_14] : memref<128x32xbf16, #tpu.memory_space<vmem>>, vector<128x32xbf16>
    tpu.vector_store %arg7[%c0_13, %c0_14], %31 {strides = array<i32>} : memref<128x32xbf16, #tpu.memory_space<vmem>>, vector<128x32xbf16>,
    %c0_15 = arith.constant 0 : index
    %c0_16 = arith.constant 0 : index
    %33 = vector.load %arg5[%c0_15, %c0_16] : memref<128x32xbf16, #tpu.memory_space<vmem>>, vector<128x32xbf16>
    %34 = vector.extract_strided_slice %0 {offsets = [0, 96], sizes = [32, 32], strides = [1, 1]} : vector<32x128xbf16> to vector<32x32xbf16>
    %cst_17 = arith.constant dense<0.000000e+00> : vector<128x32xf32>
    %35 = tpu.matmul %33, %34, %cst_17 {dimension_numbers = #tpu.dot_dimension_numbers<[1], [0], [0], [1], [0, 0, 1, 1], [], []>} : vector<128x32xbf16>, vector<32x32xbf16>, vector<128x32xf32> -> vector<128x32xf32>
    %c0_18 = arith.constant 0 : index
    %c0_19 = arith.constant 0 : index
    %36 = vector.load %arg8[%c0_18, %c0_19] : memref<128x32xf32, #tpu.memory_space<vmem>>, vector<128x32xf32>
    tpu.vector_store %arg8[%c0_18, %c0_19], %35 {strides = array<i32>} : memref<128x32xf32, #tpu.memory_space<vmem>>, vector<128x32xf32>,
    return
  }
  func.func @transform_0(%arg0: i32) -> (i32, i32) {
    %c0_i32 = arith.constant 0 : i32
    %c0_i32_0 = arith.constant 0 : i32
    %c0_i32_1 = arith.constant 0 : i32
    return %c0_i32, %c0_i32_0 : i32, i32
  }
  func.func @transform_1(%arg0: i32) -> (i32, i32) {
    %c0_i32 = arith.constant 0 : i32
    %c0_i32_0 = arith.constant 0 : i32
    %c0_i32_1 = arith.constant 0 : i32
    return %c0_i32, %c0_i32_0 : i32, i32
  }
  func.func @transform_2(%arg0: i32) -> (i32, i32) {
    %c0_i32 = arith.constant 0 : i32
    %c0_i32_0 = arith.constant 0 : i32
    %c0_i32_1 = arith.constant 0 : i32
    return %c0_i32, %c0_i32_0 : i32, i32
  }
  func.func @transform_3(%arg0: i32) -> (i32, i32) {
    %c0_i32 = arith.constant 0 : i32
    %c0_i32_0 = arith.constant 0 : i32
    %c0_i32_1 = arith.constant 0 : i32
    return %c0_i32, %c0_i32_0 : i32, i32
  }
  func.func @transform_4(%arg0: i32) -> (i32, i32) {
    %c0_i32 = arith.constant 0 : i32
    %c0_i32_0 = arith.constant 0 : i32
    %c0_i32_1 = arith.constant 0 : i32
    return %c0_i32, %c0_i32_0 : i32, i32
  }
  func.func @transform_5(%arg0: i32) -> (i32, i32) {
    %c0_i32 = arith.constant 0 : i32
    %c0_i32_0 = arith.constant 0 : i32
    %c0_i32_1 = arith.constant 0 : i32
    return %c0_i32, %c0_i32_0 : i32, i32
  }
  func.func @transform_6(%arg0: i32) -> (i32, i32) {
    %c0_i32 = arith.constant 0 : i32
    %c0_i32_0 = arith.constant 0 : i32
    %c0_i32_1 = arith.constant 0 : i32
    return %c0_i32, %c0_i32_0 : i32, i32
  }
  func.func @transform_7(%arg0: i32) -> (i32, i32) {
    %c0_i32 = arith.constant 0 : i32
    %c0_i32_0 = arith.constant 0 : i32
    %c0_i32_1 = arith.constant 0 : i32
    return %c0_i32, %c0_i32_0 : i32, i32
  }
}

</mosaic_0001>

<bundles_post_ra>
// kernel: tpu_custom_call.1
= control target key start
LH: loop header
LB: loop body
LE: loop exit
PB: predicated region body
PF: predicated region fallthrough
CT: control target
= control target key end

     0   :  { %v1623_v0 = vmov 0   ;;  %s1624_s8 = smov 32   ;;  %s1626_s25 = smov 96   ;;  %s2117_s1 = inlined_call_operand.vmem [shape: s32[128,1], index: 1, kind: input, shape index: {}]   ;;  %s2118_s0 = inlined_call_operand.vmem [shape: s32[128,1], index: 0, kind: input, shape index: {}]   ;;  %s2119_s5 = inlined_call_operand.vmem [shape: bf16[32,128], index: 5, kind: input, shape index: {}]   ;;  %s2120_s3 = inlined_call_operand.vmem [shape: bf16[128,32], index: 3, kind: input, shape index: {}]   ;;  %s2121_s4 = inlined_call_operand.vmem [shape: bf16[128,32], index: 4, kind: input, shape index: {}]   ;;  %s2122_s2 = inlined_call_operand.vmem [shape: f32[128,1], index: 2, kind: input, shape index: {}]   ;;  %s2123_s7 = inlined_call_operand.vmem [shape: f32[128,32], index: 7, kind: output, shape index: {1}]   ;;  %s2124_s6 = inlined_call_operand.vmem [shape: bf16[128,32], index: 6, kind: output, shape index: {0}]  }
   0x1   :  { %1596 = vset.pattern.permute.xlu1 %v1623_v0  ;;  %1595 = vset.pattern.permute.xlu0 %v1623_v0  ;;  %v313_v1 = vld [vmem:[%s2117_s1] sm:$0xff]  ;;  %v314_v3 = vld [vmem:[%s2117_s1 + $0x8] sm:$0xff]  ;;  %v33_v5 = vld [vmem:[%s2118_s0 + $0x18] sm:$0xff] }
   0x2   :  { %v30_v2 = vld [vmem:[%s2118_s0] sm:$0xff]  ;;  %330 = vperm.xlu1 %1596, %v313_v1   ;;  %v31_v4 = vld [vmem:[%s2118_s0 + $0x8] sm:$0xff]  ;;  %v32_v6 = vld [vmem:[%s2118_s0 + $0x10] sm:$0xff] }
   0x3   :  { %49 = vperm.xlu0 %1595, %v30_v2   ;;  %v316_v7 = vld [vmem:[%s2117_s1 + $0x18] sm:$0xff]  ;;  %v315_v8 = vld [vmem:[%s2117_s1 + $0x10] sm:$0xff]  ;;  %v35_v9 = vld [vmem:[%s2118_s0 + $0x28] sm:$0xff] }
   0x4   :  { %v34_v10 = vld [vmem:[%s2118_s0 + $0x20] sm:$0xff]  ;;  %v318_v11 = vld [vmem:[%s2117_s1 + $0x28] sm:$0xff]  ;;  %v37_v15 = vld [vmem:[%s2118_s0 + $0x38] sm:$0xff] }
   0x5   :  { %v317_v12 = vld [vmem:[%s2117_s1 + $0x20] sm:$0xff]  ;;  %v1600_v14 = vld [vmem:[%s2120_s3 + $0x8] sm:$0xff]   ;;  %v36_v17 = vld [vmem:[%s2118_s0 + $0x30] sm:$0xff] }
   0x6   :  { %333 = vperm.xlu1 %1596, %v314_v3   ;;  %v1599_v13 = vld [vmem:[%s2120_s3] sm:$0xff]   ;;  %v1603_v18 = vld [vmem:[%s2121_s4 + $0x8] sm:$0xff]   ;;  %v1602_v19 = vld [vmem:[%s2120_s3 + $0x10] sm:$0xff]   ;;  %v46_v3 = vlaneseq }
   0x7   :  { %52 = vperm.xlu0 %1595, %v31_v4   ;;  %1487 = vmatprep.subr.bf16.mxu0 %v1599_v13  ;;  %v1601_v16 = vld [vmem:[%s2121_s4] sm:$0xff]   ;;  %v1605_v20 = vld [vmem:[%s2121_s4 + $0x10] sm:$0xff]   ;;  %v320_v21 = vld [vmem:[%s2117_s1 + $0x38] sm:$0xff] }
   0x8   :  { %1488 = vmatpush3.bf16.msra.mxu0 %v1599_v13  ;;  %1519 = vmatprep.subr.bf16.mxu1 %v1601_v16  ;;  %v319_v22 = vld [vmem:[%s2117_s1 + $0x30] sm:$0xff]  ;;  %v1604_v23 = vld [vmem:[%s2120_s3 + $0x18] sm:$0xff]   ;;  %v39_v25 = vld [vmem:[%s2118_s0 + $0x48] sm:$0xff] }
   0x9   :  { %1489 = vmatprep.subr.bf16.mxu0 %v1600_v14  ;;  %1520 = vmatpush3.bf16.msra.mxu1 %v1601_v16  ;;  %v1607_v24 = vld [vmem:[%s2121_s4 + $0x18] sm:$0xff]   ;;  %v38_v26 = vld [vmem:[%s2118_s0 + $0x40] sm:$0xff]  ;;  %v322_v28 = vld [vmem:[%s2117_s1 + $0x48] sm:$0xff] }
   0xa   :  { %58 = vperm.xlu1 %1596, %v33_v5   ;;  %1521 = vmatprep.subr.bf16.mxu1 %v1603_v18  ;;  %v1606_v27 = vld [vmem:[%s2120_s3 + $0x20] sm:$0xff]   ;;  %v1608_v31 = vld [vmem:[%s2120_s3 + $0x28] sm:$0xff]   ;;  %v41_v33 = vld [vmem:[%s2118_s0 + $0x58] sm:$0xff] }
   0xb   :  { %55 = vperm.xlu0 %1595, %v32_v6   ;;  %v321_v29 = vld [vmem:[%s2117_s1 + $0x40] sm:$0xff]  ;;  %v1611_v32 = vld [vmem:[%s2121_s4 + $0x28] sm:$0xff]   ;;  %v40_v34 = vld [vmem:[%s2118_s0 + $0x50] sm:$0xff]  ;;  %v1872_v6 = vand.u32 127, %v46_v3 }
   0xc   :  { %1490 = vmatpush3.bf16.msra.mxu0 %v1600_v14  ;;  %v1609_v30 = vld [vmem:[%s2121_s4 + $0x20] sm:$0xff]   ;;  %v1610_v35 = vld [vmem:[%s2120_s3 + $0x30] sm:$0xff]   ;;  %v324_v37 = vld [vmem:[%s2117_s1 + $0x58] sm:$0xff] }
   0xd   :  { %1491 = vmatprep.subr.bf16.mxu0 %v1602_v19  ;;  %1522 = vmatpush3.bf16.msra.mxu1 %v1603_v18  ;;  %v1613_v36 = vld [vmem:[%s2121_s4 + $0x30] sm:$0xff]   ;;  %v1612_v39 = vld [vmem:[%s2120_s3 + $0x38] sm:$0xff]   ;;  %v43_v41 = vld [vmem:[%s2118_s0 + $0x68] sm:$0xff] }
   0xe   :  { %339 = vperm.xlu1 %1596, %v316_v7   ;;  %1523 = vmatprep.subr.bf16.mxu1 %v1605_v20  ;;  %v323_v38 = vld [vmem:[%s2117_s1 + $0x50] sm:$0xff]  ;;  %v1614_v40 = vld [vmem:[%s2121_s4 + $0x38] sm:$0xff]   ;;  %v42_v42 = vld [vmem:[%s2118_s0 + $0x60] sm:$0xff] }
   0xf   :  { %336 = vperm.xlu0 %1595, %v315_v8   ;;  %v1796_v43 = vld [vmem:[%s2119_s5] sm:$0xff]   ;;  %v326_v44 = vld [vmem:[%s2117_s1 + $0x68] sm:$0xff]  ;;  %v45_v46 = vld [vmem:[%s2118_s0 + $0x78] sm:$0xff] }
  0x10   :  { %1492 = vmatpush3.bf16.msra.mxu0 %v1602_v19  ;;  %v325_v45 = vld [vmem:[%s2117_s1 + $0x60] sm:$0xff]  ;;  %v44_v47 = vld [vmem:[%s2118_s0 + $0x70] sm:$0xff]  ;;  %v328_v48 = vld [vmem:[%s2117_s1 + $0x78] sm:$0xff] }
  0x11   :  { %1493 = vmatprep.subr.bf16.mxu0 %v1604_v23  ;;  %1524 = vmatpush3.bf16.msra.mxu1 %v1605_v20  ;;  %v327_v49 = vld [vmem:[%s2117_s1 + $0x70] sm:$0xff]  ;;  %v1820_v50 = vld [vmem:[%s2119_s5 + $0x8] sm:$0xff]   ;;  %v865_v52 = vld [vmem:[%s2122_s2] sm:$0xff] }
  0x12   :  { %64 = vperm.xlu1 %1596, %v35_v9   ;;  %1525 = vmatprep.subr.bf16.mxu1 %v1607_v24  ;;  %v866_v51 = vld [vmem:[%s2122_s2 + $0x8] sm:$0xff]  ;;  %v868_v53 = vld [vmem:[%s2122_s2 + $0x18] sm:$0xff]  ;;  %v867_v54 = vld [vmem:[%s2122_s2 + $0x10] sm:$0xff]  ;;  %v1625_v9 = vmov 1.0|1.0  }
  0x13   :  { %61 = vperm.xlu0 %1595, %v34_v10   ;;  %v870_v55 = vld [vmem:[%s2122_s2 + $0x28] sm:$0xff]  ;;  %v869_v56 = vld [vmem:[%s2122_s2 + $0x20] sm:$0xff]  ;;  %v872_v57 = vld [vmem:[%s2122_s2 + $0x38] sm:$0xff] }
  0x14   :  { %1494 = vmatpush3.bf16.msra.mxu0 %v1604_v23  ;;  %v871_v58 = vld [vmem:[%s2122_s2 + $0x30] sm:$0xff]  ;;  %v874_v59 = vld [vmem:[%s2122_s2 + $0x48] sm:$0xff]  ;;  %v873_v60 = vld [vmem:[%s2122_s2 + $0x40] sm:$0xff] }
  0x15   :  { %1495 = vmatprep.subr.bf16.mxu0 %v1606_v27  ;;  %1526 = vmatpush3.bf16.msra.mxu1 %v1607_v24  ;;  %v876_v61 = vld [vmem:[%s2122_s2 + $0x58] sm:$0xff]  ;;  %v875_v62 = vld [vmem:[%s2122_s2 + $0x50] sm:$0xff]  ;;  %v878_v63 = vld [vmem:[%s2122_s2 + $0x68] sm:$0xff] }
  0x16   :  { %345 = vperm.xlu1 %1596, %v318_v11   ;;  %1527 = vmatprep.subr.bf16.mxu1 %v1609_v30  ;;  %v877_v0 = vld [vmem:[%s2122_s2 + $0x60] sm:$0xff]  ;;  %v880_v1 = vld [vmem:[%s2122_s2 + $0x78] sm:$0xff]  ;;  %v879_v2 = vld [vmem:[%s2122_s2 + $0x70] sm:$0xff] }
  0x17   :  { %342 = vperm.xlu0 %1595, %v317_v12  }
  0x18   :  { %1496 = vmatpush3.bf16.msra.mxu0 %v1606_v27 }
  0x19   :  { %1497 = vmatprep.subr.bf16.mxu0 %v1608_v31  ;;  %1528 = vmatpush3.bf16.msra.mxu1 %v1609_v30 }
  0x1a   :  { %70 = vperm.xlu1 %1596, %v37_v15   ;;  %1529 = vmatprep.subr.bf16.mxu1 %v1611_v32 }
  0x1b   :  { %67 = vperm.xlu0 %1595, %v36_v17  }
  0x1c   :  { %1498 = vmatpush3.bf16.msra.mxu0 %v1608_v31 }
  0x1d   :  { %1499 = vmatprep.subr.bf16.mxu0 %v1610_v35  ;;  %1530 = vmatpush3.bf16.msra.mxu1 %v1611_v32 }
  0x1e   :  { %351 = vperm.xlu1 %1596, %v320_v21   ;;  %1531 = vmatprep.subr.bf16.mxu1 %v1613_v36 }
  0x1f   :  { %348 = vperm.xlu0 %1595, %v319_v22  }
  0x20   :  { %1500 = vmatpush3.bf16.msra.mxu0 %v1610_v35 }
  0x21   :  { %1501 = vmatprep.subr.bf16.mxu0 %v1612_v39  ;;  %1532 = vmatpush3.bf16.msra.mxu1 %v1613_v36 }
  0x22   :  { %76 = vperm.xlu1 %1596, %v39_v25   ;;  %1533 = vmatprep.subr.bf16.mxu1 %v1614_v40 }
  0x23   :  { %73 = vperm.xlu0 %1595, %v38_v26  }
  0x24   :  { %1502 = vmatpush3.bf16.msra.mxu0 %v1612_v39 }
  0x25   :  { %1534 = vmatpush3.bf16.msra.mxu1 %v1614_v40  ;;  %1551 = vmatprep.subr.bf16.mxu0 %v1796_v43 }
  0x26   :  { %357 = vperm.xlu1 %1596, %v322_v28  }
  0x27   :  { %354 = vperm.xlu0 %1595, %v321_v29  }
  0x2a   :  { %82 = vperm.xlu1 %1596, %v41_v33  }
  0x2b   :  { %79 = vperm.xlu0 %1595, %v40_v34  }
  0x2e   :  { %363 = vperm.xlu1 %1596, %v324_v37  }
  0x2f   :  { %360 = vperm.xlu0 %1595, %v323_v38  }
  0x32   :  { %88 = vperm.xlu1 %1596, %v43_v41  }
  0x33   :  { %85 = vperm.xlu0 %1595, %v42_v42  }
  0x36   :  { %369 = vperm.xlu1 %1596, %v326_v44  }
  0x37   :  { %366 = vperm.xlu0 %1595, %v325_v45  }
  0x3a   :  { %94 = vperm.xlu1 %1596, %v45_v46  }
  0x3b   :  { %91 = vperm.xlu0 %1595, %v44_v47  }
  0x3e   :  { %375 = vperm.xlu1 %1596, %v328_v48  }
  0x3f   :  { %372 = vperm.xlu0 %1595, %v327_v49  }
  0x42   :  { %1148 = vrot.lane.b32.xlu1 %v1820_v50, %s1624_s8 }
  0x43   :  { %1146 = vrot.lane.b32.xlu0 %v1796_v43, %s1624_s8 }
  0x46   :  { %888 = vperm.xlu1 %1596, %v866_v51  }
  0x47   :  { %883 = vperm.xlu0 %1595, %v865_v52  }
  0x4a   :  { %898 = vperm.xlu1 %1596, %v868_v53  }
  0x4b   :  { %893 = vperm.xlu0 %1595, %v867_v54  }
  0x4e   :  { %908 = vperm.xlu1 %1596, %v870_v55  }
  0x4f   :  { %903 = vperm.xlu0 %1595, %v869_v56  }
  0x52   :  { %918 = vperm.xlu1 %1596, %v872_v57  }
  0x53   :  { %913 = vperm.xlu0 %1595, %v871_v58  }
  0x56   :  { %928 = vperm.xlu1 %1596, %v874_v59  }
  0x57   :  { %923 = vperm.xlu0 %1595, %v873_v60  }
  0x5a   :  { %938 = vperm.xlu1 %1596, %v876_v61  }
  0x5b   :  { %933 = vperm.xlu0 %1595, %v875_v62  }
  0x5e   :  { %948 = vperm.xlu1 %1596, %v878_v63  }
  0x5f   :  { %943 = vperm.xlu0 %1595, %v877_v0  }
  0x62   :  { %958 = vperm.xlu1 %1596, %v880_v1  }
  0x63   :  { %953 = vperm.xlu0 %1595, %v879_v2  }
  0x81   :  { %v331_v4 = vpop.permute.xlu1 %330 }
  0x82   :  { %v50_v5 = vpop.permute.xlu0 %49  ;;  %vm377_vm3 = vcmp.eq.s32.totalorder %v331_v4, %v1872_v6 }
  0x83   :  { %vm96_vm0 = vcmp.eq.s32.totalorder %v50_v5, %v1872_v6 }
  0x85   :  { %v334_v7 = vpop.permute.xlu1 %333 }
  0x86   :  { %v53_v8 = vpop.permute.xlu0 %52  ;;  %vm378_vm1 = vcmp.eq.s32.totalorder %v334_v7, %v1872_v6 }
  0x87   :  { %vm97_vm2 = vcmp.eq.s32.totalorder %v53_v8, %v1872_v6  ;;  %vm1361_vm5 = vmpackc.low %vm378_vm1, %vm377_vm3 }
  0x88   :  { %vm1321_vm4 = vmpackc.low %vm97_vm2, %vm96_vm0  ;;  %1535 = vmatprep.mubr.msk.bf16.mxu1 %vm1361_vm5, %v1625_v9 }
  0x89   :  { %1503 = vmatprep.mubr.msk.bf16.mxu0 %vm1321_vm4, %v1625_v9  ;;  %v59_v10 = vpop.permute.xlu1 %58 }
  0x8a   :  { %v56_v11 = vpop.permute.xlu0 %55  ;;  %vm99_vm6 = vcmp.eq.s32.totalorder %v59_v10, %v1872_v6 }
  0x8b   :  { %vm98_vm7 = vcmp.eq.s32.totalorder %v56_v11, %v1872_v6 }
  0x8c   :  { %vm1323_vm8 = vmpackc.low %vm99_vm6, %vm98_vm7 }
  0x8d   :  { %1504 = vmatmul.mubr.msk.bf16.vlgmr.msra.gmra.mrb[0].mxu0 %vm1323_vm8, %v1625_v9  ;;  %v340_v12 = vpop.permute.xlu1 %339 }
  0x8e   :  { %v337_v13 = vpop.permute.xlu0 %336  ;;  %1552 = vmatpush3.bf16.msra.mxu0 %v1796_v43  ;;  %vm380_vm9 = vcmp.eq.s32.totalorder %v340_v12, %v1872_v6 }
  0x8f   :  { %vm379_vm10 = vcmp.eq.s32.totalorder %v337_v13, %v1872_v6  ;;  %1553 = vmatprep.subr.bf16.mxu0 %v1820_v50 }
  0x90   :  { %vm1363_vm11 = vmpackc.low %vm380_vm9, %vm379_vm10 }
  0x91   :  { %1536 = vmatmul.mubr.msk.bf16.vlgmr.msra.gmra.mrb[0].mxu1 %vm1363_vm11, %v1625_v9  ;;  %v65_v14 = vpop.permute.xlu1 %64 }
  0x92   :  { %v62_v15 = vpop.permute.xlu0 %61  ;;  %1554 = vmatpush3.bf16.msra.mxu0 %v1820_v50  ;;  %vm101_vm12 = vcmp.eq.s32.totalorder %v65_v14, %v1872_v6 }
  0x93   :  { %vm100_vm13 = vcmp.eq.s32.totalorder %v62_v15, %v1872_v6 }
  0x94   :  { %vm1325_vm14 = vmpackc.low %vm101_vm12, %vm100_vm13 }
  0x95   :  { %1507 = vmatprep.mubr.msk.bf16.mxu0 %vm1325_vm14, %v1625_v9  ;;  %v346_v16 = vpop.permute.xlu1 %345 }
  0x96   :  { %v343_v17 = vpop.permute.xlu0 %342  ;;  %vm382_vm15 = vcmp.eq.s32.totalorder %v346_v16, %v1872_v6 }
  0x97   :  { %vm381_vm0 = vcmp.eq.s32.totalorder %v343_v17, %v1872_v6 }
  0x98   :  { %vm1365_vm1 = vmpackc.low %vm382_vm15, %vm381_vm0 }
  0x99   :  { %1539 = vmatprep.mubr.msk.bf16.mxu1 %vm1365_vm1, %v1625_v9  ;;  %v71_v18 = vpop.permute.xlu1 %70 }
  0x9a   :  { %v68_v19 = vpop.permute.xlu0 %67  ;;  %vm103_vm2 = vcmp.eq.s32.totalorder %v71_v18, %v1872_v6 }
  0x9b   :  { %vm102_vm3 = vcmp.eq.s32.totalorder %v68_v19, %v1872_v6 }
  0x9c   :  { %vm1327_vm4 = vmpackc.low %vm103_vm2, %vm102_vm3 }
  0x9d   :  { %1508 = vmatmul.mubr.msk.bf16.gmra.mrb[4].mxu0 %vm1327_vm4, %v1625_v9  ;;  %v352_v20 = vpop.permute.xlu1 %351 }
  0x9e   :  { %v349_v21 = vpop.permute.xlu0 %348  ;;  %vm384_vm5 = vcmp.eq.s32.totalorder %v352_v20, %v1872_v6 }
  0x9f   :  { %vm383_vm6 = vcmp.eq.s32.totalorder %v349_v21, %v1872_v6 }
  0xa0   :  { %vm1367_vm7 = vmpackc.low %vm384_vm5, %vm383_vm6 }
  0xa1   :  { %1540 = vmatmul.mubr.msk.bf16.gmra.mrb[4].mxu1 %vm1367_vm7, %v1625_v9  ;;  %v77_v22 = vpop.permute.xlu1 %76 }
  0xa2   :  { %v74_v23 = vpop.permute.xlu0 %73  ;;  %vm105_vm8 = vcmp.eq.s32.totalorder %v77_v22, %v1872_v6 }
  0xa3   :  { %vm104_vm9 = vcmp.eq.s32.totalorder %v74_v23, %v1872_v6 }
  0xa4   :  { %vm1329_vm10 = vmpackc.low %vm105_vm8, %vm104_vm9 }
  0xa5   :  { %1511 = vmatprep.mubr.msk.bf16.mxu0 %vm1329_vm10, %v1625_v9  ;;  %v358_v24 = vpop.permute.xlu1 %357 }
  0xa6   :  { %v355_v25 = vpop.permute.xlu0 %354  ;;  %vm386_vm11 = vcmp.eq.s32.totalorder %v358_v24, %v1872_v6 }
  0xa7   :  { %vm385_vm12 = vcmp.eq.s32.totalorder %v355_v25, %v1872_v6 }
  0xa8   :  { %vm1369_vm13 = vmpackc.low %vm386_vm11, %vm385_vm12 }
  0xa9   :  { %1543 = vmatprep.mubr.msk.bf16.mxu1 %vm1369_vm13, %v1625_v9  ;;  %v83_v26 = vpop.permute.xlu1 %82 }
  0xaa   :  { %v80_v27 = vpop.permute.xlu0 %79  ;;  %vm107_vm14 = vcmp.eq.s32.totalorder %v83_v26, %v1872_v6 }
  0xab   :  { %vm106_vm15 = vcmp.eq.s32.totalorder %v80_v27, %v1872_v6 }
  0xac   :  { %vm1331_vm0 = vmpackc.low %vm107_vm14, %vm106_vm15 }
  0xad   :  { %1512 = vmatmul.mubr.msk.bf16.gmra.mrb[8].mxu0 %vm1331_vm0, %v1625_v9  ;;  %v364_v28 = vpop.permute.xlu1 %363  ;;  %vm630_vm0 = vcmask 261120  }
  0xae   :  { %v361_v29 = vpop.permute.xlu0 %360  ;;  %vm388_vm1 = vcmp.eq.s32.totalorder %v364_v28, %v1872_v6 }
  0xaf   :  { %vm387_vm2 = vcmp.eq.s32.totalorder %v361_v29, %v1872_v6 }
  0xb0   :  { %vm1371_vm3 = vmpackc.low %vm388_vm1, %vm387_vm2  ;;  %vm1073_vm1 = vcmask 257024  }
  0xb1   :  { %1544 = vmatmul.mubr.msk.bf16.gmra.mrb[8].mxu1 %vm1371_vm3, %v1625_v9  ;;  %v89_v30 = vpop.permute.xlu1 %88 }
  0xb2   :  { %v86_v31 = vpop.permute.xlu0 %85  ;;  %vm109_vm4 = vcmp.eq.s32.totalorder %v89_v30, %v1872_v6 }
  0xb3   :  { %vm108_vm5 = vcmp.eq.s32.totalorder %v86_v31, %v1872_v6 }
  0xb4   :  { %vm1333_vm6 = vmpackc.low %vm109_vm4, %vm108_vm5 }
  0xb5   :  { %1515 = vmatprep.mubr.msk.bf16.mxu0 %vm1333_vm6, %v1625_v9  ;;  %v370_v32 = vpop.permute.xlu1 %369 }
  0xb6   :  { %v367_v33 = vpop.permute.xlu0 %366  ;;  %vm390_vm7 = vcmp.eq.s32.totalorder %v370_v32, %v1872_v6  ;;  %v1615_v32 = vld [vmem:[%s2121_s4] sm:$0xff]  }
  0xb7   :  { %vm389_vm8 = vcmp.eq.s32.totalorder %v367_v33, %v1872_v6  ;;  %v1616_v33 = vld [vmem:[%s2121_s4 + $0x8] sm:$0xff]  }
  0xb8   :  { %vm1373_vm9 = vmpackc.low %vm390_vm7, %vm389_vm8 }
  0xb9   :  { %1547 = vmatprep.mubr.msk.bf16.mxu1 %vm1373_vm9, %v1625_v9  ;;  %v95_v34 = vpop.permute.xlu1 %94 }
  0xba   :  { %v92_v35 = vpop.permute.xlu0 %91  ;;  %vm111_vm10 = vcmp.eq.s32.totalorder %v95_v34, %v1872_v6  ;;  %v1617_v34 = vld [vmem:[%s2121_s4 + $0x10] sm:$0xff]  }
  0xbb   :  { %vm110_vm11 = vcmp.eq.s32.totalorder %v92_v35, %v1872_v6  ;;  %v1618_v35 = vld [vmem:[%s2121_s4 + $0x18] sm:$0xff]  }
  0xbc   :  { %vm1335_vm12 = vmpackc.low %vm111_vm10, %vm110_vm11 }
  0xbd   :  { %1516 = vmatmul.mubr.msk.bf16.gmra.mrb[12].mxu0 %vm1335_vm12, %v1625_v9  ;;  %v376_v36 = vpop.permute.xlu1 %375 }
  0xbe   :  { %v373_v37 = vpop.permute.xlu0 %372  ;;  %vm392_vm13 = vcmp.eq.s32.totalorder %v376_v36, %v1872_v6  ;;  %v1619_v36 = vld [vmem:[%s2121_s4 + $0x20] sm:$0xff]  }
  0xbf   :  { %vm391_vm14 = vcmp.eq.s32.totalorder %v373_v37, %v1872_v6  ;;  %v1620_v37 = vld [vmem:[%s2121_s4 + $0x28] sm:$0xff]  }
  0xc0   :  { %vm1375_vm15 = vmpackc.low %vm392_vm13, %vm391_vm14 }
  0xc1   :  { %1548 = vmatmul.mubr.msk.bf16.gmra.mrb[12].mxu1 %vm1375_vm15, %v1625_v9  ;;  %v1149_v39 = vpop.permute.xlu1 %1148 }
  0xc2   :  { %v1147_v38 = vpop.permute.xlu0 %1146  ;;  %1575 = vmatprep.mubr.msk.bf16.mxu1 %vm630_vm0, %v1615_v32 }
  0xc3   :  { %1571 = vmatprep.subr.bf16.mxu1 %v1147_v38 }
  0xc4   :  { %1572 = vmatpush3.bf16.msra.mxu1 %v1147_v38  ;;  %v1621_v38 = vld [vmem:[%s2121_s4 + $0x30] sm:$0xff]  }
  0xc5   :  { %1573 = vmatprep.subr.bf16.mxu1 %v1149_v39 }
  0xc8   :  { %1574 = vmatpush3.bf16.msra.mxu1 %v1149_v39  ;;  %v1622_v39 = vld [vmem:[%s2121_s4 + $0x38] sm:$0xff]  }
  0xcb   :  { %1576 = vmatmul.mubr.msk.bf16.vlgmr.msra.gmra.mrb[16].mxu1 %vm630_vm0, %v1616_v33 }
  0xcc   :  { %1579 = vmatprep.mubr.msk.bf16.mxu1 %vm630_vm0, %v1617_v34 }
  0xd3   :  { %1580 = vmatmul.mubr.msk.bf16.gmra.mrb[20].mxu1 %vm630_vm0, %v1618_v35 }
  0xd4   :  { %1583 = vmatprep.mubr.msk.bf16.mxu1 %vm630_vm0, %v1619_v36 }
  0xdb   :  { %1584 = vmatmul.mubr.msk.bf16.gmra.mrb[24].mxu1 %vm630_vm0, %v1620_v37 }
  0xdc   :  { %1587 = vmatprep.mubr.msk.bf16.mxu1 %vm630_vm0, %v1621_v38 }
  0xe3   :  { %1588 = vmatmul.mubr.msk.bf16.gmra.mrb[28].mxu1 %vm630_vm0, %v1622_v39 }
 0x160   :  { %v1505_v40 = vpop.f32.mrb[0].mxu0 }
 0x161   :  { %v250_v41 = vpop.f32.mrb[1].mxu0 }
 0x162   :  { %v1506_v42 = vpop.f32.mrb[2].mxu0 }
 0x163   :  { %v253_v43 = vpop.f32.mrb[3].mxu0 }
 0x164   :  { %v1537_v44 = vpop.f32.mrb[0].mxu1 }
 0x165   :  { %v596_v45 = vmul.f32 %v1537_v44, %v1505_v40  ;;  %v531_v46 = vpop.f32.mrb[1].mxu1 }
 0x166   :  { %v594_v47 = vmul.f32 %v531_v46, %v250_v41  ;;  %v1538_v48 = vpop.f32.mrb[2].mxu1 }
 0x167   :  { %v597_v49 = vmul.f32 %v1538_v48, %v1506_v42  ;;  %v534_v50 = vpop.f32.mrb[3].mxu1 }
 0x168   :  { %v595_v51 = vmul.f32 %v534_v50, %v253_v43 }
 0x169   :  { %v611_v52 = vpack.c.bf16 %v597_v49, %v596_v45 }
 0x16a   :  { %v610_v53 = vpack.c.bf16 %v595_v51, %v594_v47 }
 0x16c   :  { %1555 = vmatprep.mubr.msk.bf16.mxu0 %vm630_vm0, %v610_v53  ;;  %v889_v53 = vpop.permute.xlu1 %888 }
 0x16d   :  { %1556 = vmatmul.mubr.msk.bf16.vlgmr.msra.gmra.mrb[16].mxu0 %vm630_vm0, %v611_v52  ;;  %v884_v52 = vpop.permute.xlu0 %883 }
 0x170   :  { %v1509_v54 = vpop.f32.mrb[4].mxu0 }
 0x171   :  { %v266_v55 = vpop.f32.mrb[5].mxu0 }
 0x172   :  { %v1510_v56 = vpop.f32.mrb[6].mxu0 }
 0x173   :  { %v269_v57 = vpop.f32.mrb[7].mxu0 }
 0x174   :  { %v1541_v58 = vpop.f32.mrb[4].mxu1 }
 0x175   :  { %v600_v59 = vmul.f32 %v1541_v58, %v1509_v54  ;;  %v547_v60 = vpop.f32.mrb[5].mxu1 }
 0x176   :  { %v598_v61 = vmul.f32 %v547_v60, %v266_v55  ;;  %v1542_v62 = vpop.f32.mrb[6].mxu1  ;;  %v899_v60 = vpop.permute.xlu1 %898 }
 0x177   :  { %v601_v63 = vmul.f32 %v1542_v62, %v1510_v56  ;;  %v550_v0 = vpop.f32.mrb[7].mxu1 }
 0x178   :  { %v599_v1 = vmul.f32 %v550_v0, %v269_v57  ;;  %v894_v57 = vpop.permute.xlu0 %893 }
 0x179   :  { %v613_v2 = vpack.c.bf16 %v601_v63, %v600_v59 }
 0x17a   :  { %v612_v3 = vpack.c.bf16 %v599_v1, %v598_v61 }
 0x17c   :  { %1559 = vmatprep.mubr.msk.bf16.mxu0 %vm630_vm0, %v612_v3  ;;  %v904_v0 = vpop.permute.xlu0 %903  ;;  %v909_v3 = vpop.permute.xlu1 %908 }
 0x17d   :  { %1560 = vmatmul.mubr.msk.bf16.gmra.mrb[20].mxu0 %vm630_vm0, %v613_v2 }
 0x180   :  { %v1513_v4 = vpop.f32.mrb[8].mxu0 }
 0x181   :  { %v282_v5 = vpop.f32.mrb[9].mxu0 }
 0x182   :  { %v1514_v6 = vpop.f32.mrb[10].mxu0 }
 0x183   :  { %v285_v7 = vpop.f32.mrb[11].mxu0 }
 0x184   :  { %v1545_v8 = vpop.f32.mrb[8].mxu1 }
 0x185   :  { %v604_v9 = vmul.f32 %v1545_v8, %v1513_v4  ;;  %v563_v10 = vpop.f32.mrb[9].mxu1  ;;  %v914_v8 = vpop.permute.xlu0 %913 }
 0x186   :  { %v602_v11 = vmul.f32 %v563_v10, %v282_v5  ;;  %v1546_v12 = vpop.f32.mrb[10].mxu1 }
 0x187   :  { %v605_v13 = vmul.f32 %v1546_v12, %v1514_v6  ;;  %v566_v14 = vpop.f32.mrb[11].mxu1 }
 0x188   :  { %v603_v15 = vmul.f32 %v566_v14, %v285_v7 }
 0x189   :  { %v615_v16 = vpack.c.bf16 %v605_v13, %v604_v9 }
 0x18a   :  { %v614_v17 = vpack.c.bf16 %v603_v15, %v602_v11  ;;  %v919_v11 = vpop.permute.xlu1 %918 }
 0x18c   :  { %1563 = vmatprep.mubr.msk.bf16.mxu0 %vm630_vm0, %v614_v17 }
 0x18d   :  { %1564 = vmatmul.mubr.msk.bf16.gmra.mrb[24].mxu0 %vm630_vm0, %v615_v16  ;;  %v924_v16 = vpop.permute.xlu0 %923 }
 0x18e   :  { %v929_v17 = vpop.permute.xlu1 %928 }
 0x190   :  { %v1517_v18 = vpop.f32.mrb[12].mxu0 }
 0x191   :  { %v298_v19 = vpop.f32.mrb[13].mxu0 }
 0x192   :  { %v1518_v20 = vpop.f32.mrb[14].mxu0 }
 0x193   :  { %v301_v21 = vpop.f32.mrb[15].mxu0 }
 0x194   :  { %v1549_v22 = vpop.f32.mrb[12].mxu1 }
 0x195   :  { %v608_v23 = vmul.f32 %v1549_v22, %v1517_v18  ;;  %v579_v24 = vpop.f32.mrb[13].mxu1  ;;  %v934_v18 = vpop.permute.xlu0 %933 }
 0x196   :  { %v606_v25 = vmul.f32 %v579_v24, %v298_v19  ;;  %v1550_v26 = vpop.f32.mrb[14].mxu1 }
 0x197   :  { %v609_v27 = vmul.f32 %v1550_v26, %v1518_v20  ;;  %v582_v28 = vpop.f32.mrb[15].mxu1  ;;  %v939_v20 = vpop.permute.xlu1 %938 }
 0x198   :  { %v607_v29 = vmul.f32 %v582_v28, %v301_v21 }
 0x199   :  { %v617_v30 = vpack.c.bf16 %v609_v27, %v608_v23  ;;  %v944_v24 = vpop.permute.xlu0 %943 }
 0x19a   :  { %v616_v31 = vpack.c.bf16 %v607_v29, %v606_v25 }
 0x19b   :  { %v949_v25 = vpop.permute.xlu1 %948 }
 0x19c   :  { %1567 = vmatprep.mubr.msk.bf16.mxu0 %vm630_vm0, %v616_v31 }
 0x19d   :  { %1568 = vmatmul.mubr.msk.bf16.gmra.mrb[28].mxu0 %vm630_vm0, %v617_v30  ;;  %v954_v29 = vpop.permute.xlu0 %953 }
 0x19e   :  { %v1577_v19 = vpop.f32.mrb[16].mxu1 }
 0x19f   :  { %1275 = vst.msk [vmem:[%s2123_s7 + $0x10] sm:$0xff] %vm630_vm0, %v1577_v19  ;;  %v1210_v21 = vpop.f32.mrb[17].mxu1  ;;  %v959_v31 = vpop.permute.xlu1 %958 }
 0x1a0   :  { %1273 = vst.msk [vmem:[%s2123_s7] sm:$0xff] %vm630_vm0, %v1210_v21  ;;  %v1578_v22 = vpop.f32.mrb[18].mxu1 }
 0x1a1   :  { %1276 = vst.msk [vmem:[%s2123_s7 + $0x18] sm:$0xff] %vm630_vm0, %v1578_v22  ;;  %v1213_v23 = vpop.f32.mrb[19].mxu1 }
 0x1a2   :  { %1274 = vst.msk [vmem:[%s2123_s7 + $0x8] sm:$0xff] %vm630_vm0, %v1213_v23 }
 0x1a6   :  { %v1581_v26 = vpop.f32.mrb[20].mxu1 }
 0x1a7   :  { %1279 = vst.msk [vmem:[%s2123_s7 + $0x30] sm:$0xff] %vm630_vm0, %v1581_v26  ;;  %v1226_v27 = vpop.f32.mrb[21].mxu1 }
 0x1a8   :  { %1277 = vst.msk [vmem:[%s2123_s7 + $0x20] sm:$0xff] %vm630_vm0, %v1226_v27  ;;  %v1582_v28 = vpop.f32.mrb[22].mxu1 }
 0x1a9   :  { %1280 = vst.msk [vmem:[%s2123_s7 + $0x38] sm:$0xff] %vm630_vm0, %v1582_v28  ;;  %v1229_v30 = vpop.f32.mrb[23].mxu1 }
 0x1aa   :  { %1278 = vst.msk [vmem:[%s2123_s7 + $0x28] sm:$0xff] %vm630_vm0, %v1229_v30 }
 0x1ae   :  { %v1585_v34 = vpop.f32.mrb[24].mxu1 }
 0x1af   :  { %1283 = vst.msk [vmem:[%s2123_s7 + $0x50] sm:$0xff] %vm630_vm0, %v1585_v34  ;;  %v1242_v36 = vpop.f32.mrb[25].mxu1 }
 0x1b0   :  { %1281 = vst.msk [vmem:[%s2123_s7 + $0x40] sm:$0xff] %vm630_vm0, %v1242_v36  ;;  %v1586_v39 = vpop.f32.mrb[26].mxu1 }
 0x1b1   :  { %1284 = vst.msk [vmem:[%s2123_s7 + $0x58] sm:$0xff] %vm630_vm0, %v1586_v39 }
 0x240   :  { %v1557_v40 = vpop.f32.mrb[16].mxu0 }
 0x241   :  { %v689_v41 = vpop.f32.mrb[17].mxu0  ;;  %v963_v62 = vmul.f32 %v1557_v40, %v894_v57 }
 0x242   :  { %v1558_v42 = vpop.f32.mrb[18].mxu0  ;;  %v961_v59 = vmul.f32 %v884_v52, %v689_v41  ;;  %v1245_v41 = vpop.f32.mrb[27].mxu1 }
 0x243   :  { %v692_v43 = vpop.f32.mrb[19].mxu0  ;;  %v964_v1 = vmul.f32 %v1558_v42, %v899_v60  ;;  %v1421_v4 = vpack.c.bf16 %v963_v62, %v963_v62  ;;  %1282 = vst.msk [vmem:[%s2123_s7 + $0x48] sm:$0xff] %vm630_vm0, %v1245_v41 }
 0x244   :  { %v962_v61 = vmul.f32 %v889_v53, %v692_v43  ;;  %v1419_v63 = vpack.c.bf16 %v961_v59, %v961_v59 }
 0x245   :  { %v1422_v6 = vpack.c.bf16 %v964_v1, %v964_v1 }
 0x246   :  { %v1420_v2 = vpack.c.bf16 %v962_v61, %v962_v61 }
 0x250   :  { %v1561_v44 = vpop.f32.mrb[20].mxu0 }
 0x251   :  { %v705_v45 = vpop.f32.mrb[21].mxu0  ;;  %v967_v9 = vmul.f32 %v1561_v44, %v914_v8 }
 0x252   :  { %v1562_v46 = vpop.f32.mrb[22].mxu0  ;;  %v965_v5 = vmul.f32 %v904_v0, %v705_v45 }
 0x253   :  { %v708_v47 = vpop.f32.mrb[23].mxu0  ;;  %v968_v12 = vmul.f32 %v1562_v46, %v919_v11  ;;  %v1425_v14 = vpack.c.bf16 %v967_v9, %v967_v9 }
 0x254   :  { %v966_v7 = vmul.f32 %v909_v3, %v708_v47  ;;  %v1423_v10 = vpack.c.bf16 %v965_v5, %v965_v5 }
 0x255   :  { %v1426_v15 = vpack.c.bf16 %v968_v12, %v968_v12 }
 0x256   :  { %v1424_v13 = vpack.c.bf16 %v966_v7, %v966_v7 }
 0x260   :  { %v1565_v48 = vpop.f32.mrb[24].mxu0 }
 0x261   :  { %821 = vrot.lane.b32.xlu0 %v1565_v48, %s1626_s25  ;;  %v721_v49 = vpop.f32.mrb[25].mxu0  ;;  %v1589_v48 = vpop.f32.mrb[28].mxu1 }
 0x262   :  { %v1566_v50 = vpop.f32.mrb[26].mxu0  ;;  %1287 = vst.msk [vmem:[%s2123_s7 + $0x70] sm:$0xff] %vm630_vm0, %v1589_v48 }
 0x263   :  { %823 = vrot.lane.b32.xlu1 %v1566_v50, %s1626_s25  ;;  %v724_v51 = vpop.f32.mrb[27].mxu0 }
 0x265   :  { %817 = vrot.lane.b32.xlu0 %v721_v49, %s1626_s25  ;;  %v1258_v49 = vpop.f32.mrb[29].mxu1 }
 0x266   :  { %1285 = vst.msk [vmem:[%s2123_s7 + $0x60] sm:$0xff] %vm630_vm0, %v1258_v49  ;;  %v1590_v50 = vpop.f32.mrb[30].mxu1 }
 0x267   :  { %819 = vrot.lane.b32.xlu1 %v724_v51, %s1626_s25  ;;  %1288 = vst.msk [vmem:[%s2123_s7 + $0x78] sm:$0xff] %vm630_vm0, %v1590_v50  ;;  %v1261_v51 = vpop.f32.mrb[31].mxu1 }
 0x268   :  { %1286 = vst.msk [vmem:[%s2123_s7 + $0x68] sm:$0xff] %vm630_vm0, %v1261_v51 }
 0x270   :  { %v1569_v54 = vpop.f32.mrb[28].mxu0 }
 0x271   :  { %v737_v55 = vpop.f32.mrb[29].mxu0 }
 0x272   :  { %825 = vrot.lane.b32.xlu0 %v737_v55, %s1626_s25  ;;  %v1570_v56 = vpop.f32.mrb[30].mxu0 }
 0x273   :  { %v740_v58 = vpop.f32.mrb[31].mxu0 }
 0x274   :  { %827 = vrot.lane.b32.xlu1 %v740_v58, %s1626_s25 }
 0x276   :  { %829 = vrot.lane.b32.xlu0 %v1569_v54, %s1626_s25 }
 0x278   :  { %831 = vrot.lane.b32.xlu1 %v1570_v56, %s1626_s25 }
 0x27a   :  { %1025 = vrot.lane.b32.xlu0 %v1419_v63, %s1626_s25 }
 0x27c   :  { %1027 = vrot.lane.b32.xlu1 %v1420_v2, %s1626_s25 }
 0x27e   :  { %1029 = vrot.lane.b32.xlu0 %v1421_v4, %s1626_s25 }
 0x280   :  { %1031 = vrot.lane.b32.xlu1 %v1422_v6, %s1626_s25 }
 0x282   :  { %1033 = vrot.lane.b32.xlu0 %v1423_v10, %s1626_s25 }
 0x284   :  { %1035 = vrot.lane.b32.xlu1 %v1424_v13, %s1626_s25 }
 0x286   :  { %1037 = vrot.lane.b32.xlu0 %v1425_v14, %s1626_s25 }
 0x288   :  { %1039 = vrot.lane.b32.xlu1 %v1426_v15, %s1626_s25 }
 0x2d3   :  { %v822_v32 = vpop.permute.xlu0 %821 }
 0x2d4   :  { %v971_v33 = vmul.f32 %v934_v18, %v822_v32 }
 0x2d5   :  { %v824_v35 = vpop.permute.xlu1 %823 }
 0x2d6   :  { %v1429_v37 = vpack.c.bf16 %v971_v33, %v971_v33  ;;  %v972_v38 = vmul.f32 %v939_v20, %v824_v35 }
 0x2d7   :  { %v818_v40 = vpop.permute.xlu0 %817 }
 0x2d8   :  { %v1430_v42 = vpack.c.bf16 %v972_v38, %v972_v38  ;;  %v969_v43 = vmul.f32 %v924_v16, %v818_v40  ;;  %1045 = vrot.lane.b32.xlu0 %v1429_v37, %s1626_s25 }
 0x2d9   :  { %v820_v44 = vpop.permute.xlu1 %819 }
 0x2da   :  { %v1427_v45 = vpack.c.bf16 %v969_v43, %v969_v43  ;;  %v970_v46 = vmul.f32 %v929_v17, %v820_v44  ;;  %1047 = vrot.lane.b32.xlu1 %v1430_v42, %s1626_s25 }
 0x2dc   :  { %v1428_v47 = vpack.c.bf16 %v970_v46, %v970_v46  ;;  %1041 = vrot.lane.b32.xlu0 %v1427_v45, %s1626_s25 }
 0x2de   :  { %1043 = vrot.lane.b32.xlu1 %v1428_v47, %s1626_s25 }
 0x2e4   :  { %v826_v52 = vpop.permute.xlu0 %825 }
 0x2e5   :  { %v973_v53 = vmul.f32 %v944_v24, %v826_v52 }
 0x2e6   :  { %v828_v54 = vpop.permute.xlu1 %827 }
 0x2e7   :  { %v1431_v55 = vpack.c.bf16 %v973_v53, %v973_v53  ;;  %v974_v56 = vmul.f32 %v949_v25, %v828_v54 }
 0x2e8   :  { %v830_v57 = vpop.permute.xlu0 %829 }
 0x2e9   :  { %v1432_v58 = vpack.c.bf16 %v974_v56, %v974_v56  ;;  %v975_v59 = vmul.f32 %v954_v29, %v830_v57  ;;  %1049 = vrot.lane.b32.xlu0 %v1431_v55, %s1626_s25 }
 0x2ea   :  { %v832_v60 = vpop.permute.xlu1 %831 }
 0x2eb   :  { %v1433_v61 = vpack.c.bf16 %v975_v59, %v975_v59  ;;  %v976_v62 = vmul.f32 %v959_v31, %v832_v60  ;;  %1051 = vrot.lane.b32.xlu1 %v1432_v58, %s1626_s25 }
 0x2ec   :  { %v1026_v63 = vpop.permute.xlu0 %1025 }
 0x2ed   :  { %v1434_v0 = vpack.c.bf16 %v976_v62, %v976_v62  ;;  %1074 = vst.msk [vmem:[%s2124_s6] sm:$0xf] %vm1073_vm1, %v1026_v63  ;;  %1053 = vrot.lane.b32.xlu0 %v1433_v61, %s1626_s25 }
 0x2ee   :  { %v1028_v1 = vpop.permute.xlu1 %1027 }
 0x2ef   :  { %1075 = vst.msk [vmem:[%s2124_s6 + $0x4] sm:$0xf] %vm1073_vm1, %v1028_v1  ;;  %1055 = vrot.lane.b32.xlu1 %v1434_v0, %s1626_s25 }
 0x2f0   :  { %v1030_v2 = vpop.permute.xlu0 %1029 }
 0x2f1   :  { %1076 = vst.msk [vmem:[%s2124_s6 + $0x8] sm:$0xf] %vm1073_vm1, %v1030_v2 }
 0x2f2   :  { %v1032_v3 = vpop.permute.xlu1 %1031 }
 0x2f3   :  { %1077 = vst.msk [vmem:[%s2124_s6 + $0xc] sm:$0xf] %vm1073_vm1, %v1032_v3 }
 0x2f4   :  { %v1034_v4 = vpop.permute.xlu0 %1033 }
 0x2f5   :  { %1078 = vst.msk [vmem:[%s2124_s6 + $0x10] sm:$0xf] %vm1073_vm1, %v1034_v4 }
 0x2f6   :  { %v1036_v5 = vpop.permute.xlu1 %1035 }
 0x2f7   :  { %1079 = vst.msk [vmem:[%s2124_s6 + $0x14] sm:$0xf] %vm1073_vm1, %v1036_v5 }
 0x2f8   :  { %v1038_v6 = vpop.permute.xlu0 %1037 }
 0x2f9   :  { %1080 = vst.msk [vmem:[%s2124_s6 + $0x18] sm:$0xf] %vm1073_vm1, %v1038_v6 }
 0x2fa   :  { %v1040_v7 = vpop.permute.xlu1 %1039 }
 0x2fb   :  { %1081 = vst.msk [vmem:[%s2124_s6 + $0x1c] sm:$0xf] %vm1073_vm1, %v1040_v7 }
 0x34a   :  { %v1046_v8 = vpop.permute.xlu0 %1045 }
 0x34b   :  { %1084 = vst.msk [vmem:[%s2124_s6 + $0x28] sm:$0xf] %vm1073_vm1, %v1046_v8 }
 0x34c   :  { %v1048_v9 = vpop.permute.xlu1 %1047 }
 0x34d   :  { %1085 = vst.msk [vmem:[%s2124_s6 + $0x2c] sm:$0xf] %vm1073_vm1, %v1048_v9 }
 0x34e   :  { %v1042_v10 = vpop.permute.xlu0 %1041 }
 0x34f   :  { %1082 = vst.msk [vmem:[%s2124_s6 + $0x20] sm:$0xf] %vm1073_vm1, %v1042_v10 }
 0x350   :  { %v1044_v11 = vpop.permute.xlu1 %1043 }
 0x351   :  { %1083 = vst.msk [vmem:[%s2124_s6 + $0x24] sm:$0xf] %vm1073_vm1, %v1044_v11 }
 0x35b   :  { %v1050_v12 = vpop.permute.xlu0 %1049 }
 0x35c   :  { %1086 = vst.msk [vmem:[%s2124_s6 + $0x30] sm:$0xf] %vm1073_vm1, %v1050_v12 }
 0x35d   :  { %v1052_v13 = vpop.permute.xlu1 %1051 }
 0x35e   :  { %1087 = vst.msk [vmem:[%s2124_s6 + $0x34] sm:$0xf] %vm1073_vm1, %v1052_v13 }
 0x35f   :  { %v1054_v14 = vpop.permute.xlu0 %1053 }
 0x360   :  { %1088 = vst.msk [vmem:[%s2124_s6 + $0x38] sm:$0xf] %vm1073_vm1, %v1054_v14 }
 0x361   :  { %v1056_v15 = vpop.permute.xlu1 %1055 }
 0x362   :  { %1089 = vst.msk [vmem:[%s2124_s6 + $0x3c] sm:$0xf] %vm1073_vm1, %v1056_v15 }

</bundles_post_ra>
